<compile_context>
chip_gen: v7x
topology: tpu7x:2x2x1
jax: 0.10.0
libtpu: 0.0.40
codegen_flags: <defaults>
</compile_context>

<pallas_src>
import functools

import jax
import jax.numpy as jnp
from jax.experimental import pallas as pl
from jax.experimental.pallas import tpu as pltpu

C_IN, C_OUT, KH, KW, STRIDE = 4, 1, 3, 3, 2
NEG_SLOPE = -0.92


def _conv_where_kernel(x_ref, m_ref, rs_ref, b_ref, out_ref, *, nb):
    """Fused stride-2 conv + leaky-where for `nb` batches per grid step.

    x_ref  : (nb, C_IN, H, W)    VMEM  raw NCHW input tile
    m_ref  : (C_IN, KH, W, OW)   VMEM  weights folded with stride-2 col-select
    rs_ref : (KH, OH, H)         VMEM  0/1 stride-2 row selectors
    b_ref  : (1,)                SMEM  bias
    out_ref: (nb, C_OUT, OH, OW) VMEM
    """
    bias = b_ref[0]
    for b in range(nb):
        acc = None
        for kh in range(KH):
            # z[h, j] = sum_c sum_kw W[c,kh,kw] * x[b,c,h,2j+kw]
            z = None
            for c in range(C_IN):
                y = jnp.dot(x_ref[b, c], m_ref[c, kh],
                            preferred_element_type=jnp.float32)
                z = y if z is None else z + y
            # part[i, j] = z[2i + kh, j]  (stride-2 row selection via MXU)
            part = jnp.dot(rs_ref[kh], z, preferred_element_type=jnp.float32)
            acc = part if acc is None else acc + part
        v1 = acc + bias
        out_ref[b, 0] = jnp.where(v1 > 0, v1, v1 * NEG_SLOPE)


def _fold_weights(weight, h, w, oh, ow):
    """Fold conv weights + stride-2 window selection into constant matrices."""
    wk = weight.astype(jnp.float32).reshape(C_IN, KH, KW)          # C_OUT == 1
    # m[c, kh, w, j] = wk[c, kh, w - 2j] if 0 <= w - 2j < KW else 0
    kw_idx = jnp.arange(w)[:, None] - STRIDE * jnp.arange(ow)[None, :]  # (W,OW)
    valid = (kw_idx >= 0) & (kw_idx < KW)
    m = jnp.where(valid[None, None],
                  wk[:, :, jnp.clip(kw_idx, 0, KW - 1)], 0.0)      # (C,KH,W,OW)
    # rowsel[kh, i, h] = 1 iff h == 2i + kh
    rowsel = (jnp.arange(h)[None, None, :] ==
              (STRIDE * jnp.arange(oh)[None, :, None]
               + jnp.arange(KH)[:, None, None])).astype(jnp.float32)  # (KH,OH,H)
    return m, rowsel


@jax.jit
def model_forward(x, weight, bias):
    n, c, h, w = x.shape
    assert c == C_IN
    oh = (h - KH) // STRIDE + 1
    ow = (w - KW) // STRIDE + 1

    x = x.astype(jnp.float32)
    m, rowsel = _fold_weights(weight, h, w, oh, ow)
    b_flat = bias.astype(jnp.float32).reshape(C_OUT)

    # >= 2 parallel grid steps when possible (v7x: 2 TensorCores); otherwise
    # as few steps as possible (per-step overhead on single-core v5e/v6e).
    nb = n // 2 if (n >= 2 and n % 2 == 0) else 1
    grid = (n // nb,)

    kernel = functools.partial(_conv_where_kernel, nb=nb)
    flops = 2 * C_IN * KH * KW * n * oh * ow
    bytes_accessed = (x.size + n * C_OUT * oh * ow + m.size + rowsel.size + 1) * 4

    out = pl.pallas_call(
        kernel,
        out_shape=jax.ShapeDtypeStruct((n, C_OUT, oh, ow), jnp.float32),
        grid=grid,
        in_specs=[
            pl.BlockSpec((nb, C_IN, h, w), lambda i: (i, 0, 0, 0)),
            pl.BlockSpec((C_IN, KH, w, ow), lambda i: (0, 0, 0, 0)),
            pl.BlockSpec((KH, oh, h), lambda i: (0, 0, 0)),
            pl.BlockSpec(memory_space=pltpu.MemorySpace.SMEM),
        ],
        out_specs=pl.BlockSpec((nb, C_OUT, oh, ow), lambda i: (i, 0, 0, 0)),
        compiler_params=pltpu.CompilerParams(
            dimension_semantics=("parallel",)),
        cost_estimate=pl.CostEstimate(
            flops=flops, transcendentals=0, bytes_accessed=bytes_accessed),
    )(x, m, rowsel, b_flat)
    return out                                              # already NCHW


def _reference(x, weight, bias):
    v1 = jax.lax.conv_general_dilated(
        x, weight, window_strides=(STRIDE, STRIDE), padding="VALID",
        dimension_numbers=("NCHW", "OIHW", "NCHW"),
        precision=jax.lax.Precision.HIGHEST) + bias.reshape(1, C_OUT, 1, 1)
    return jnp.where(v1 > 0, v1, v1 * NEG_SLOPE)


if __name__ == "__main__":
    key = jax.random.PRNGKey(0)
    kx, kw, kb = jax.random.split(key, 3)

    # Deterministic synthetic parameters (Conv2d(4, 1, 3) shapes).
    fan_in = C_IN * KH * KW
    bound = 1.0 / (fan_in ** 0.5)
    weight = jax.random.uniform(kw, (C_OUT, C_IN, KH, KW),
                                minval=-bound, maxval=bound, dtype=jnp.float32)
    bias = jax.random.uniform(kb, (C_OUT,), minval=-bound, maxval=bound,
                              dtype=jnp.float32)

    x = jax.random.normal(kx, (2, 4, 16, 16), dtype=jnp.float32)

    out = jax.block_until_ready(model_forward(x, weight, bias))
    ref = jax.block_until_ready(_reference(x, weight, bias))

    assert out.shape == (2, 1, 7, 7), out.shape
    # MXU may round f32 operands through bf16 passes -> modest tolerance.
    err = float(jnp.max(jnp.abs(out - ref)))
    assert jnp.allclose(out, ref, atol=2e-2, rtol=2e-2), f"mismatch, max err {err}"
    print("KERNEL_OK")
</pallas_src>

<mosaic_0001>
module attributes {stable_mosaic.version = 11 : i64} {
  func.func @_conv_where_kernel(%arg0: i32, %arg1: memref<1x4x16x16xf32, #tpu.memory_space<vmem>>, %arg2: memref<4x3x16x7xf32, #tpu.memory_space<vmem>>, %arg3: memref<3x7x16xf32, #tpu.memory_space<vmem>>, %arg4: memref<1xf32, #tpu.memory_space<smem>>, %arg5: memref<1x1x7x7xf32, #tpu.memory_space<vmem>>) attributes {dimension_semantics = [#tpu.dimension_semantics<parallel>], iteration_bounds = array<i64: 2>, scalar_prefetch = 0 : i64, scratch_operands = 0 : i64, tpu.core_type = #tpu.core_type<tc>, window_params = [{transform_indices = @transform_0, window_bounds = array<i64: 1, 4, 16, 16>}, {pipeline_mode = #tpu.pipeline_mode<synchronous>, transform_indices = @transform_1, window_bounds = array<i64: 4, 3, 16, 7>}, {pipeline_mode = #tpu.pipeline_mode<synchronous>, transform_indices = @transform_2, window_bounds = array<i64: 3, 7, 16>}, {transform_indices = @transform_3, window_bounds = array<i64: 1>}, {transform_indices = @transform_4, window_bounds = array<i64: 1, 1, 7, 7>}]} {
    %c0 = arith.constant 0 : index
    %0 = memref.load %arg4[%c0] : memref<1xf32, #tpu.memory_space<smem>>
    %c0_0 = arith.constant 0 : index
    %c0_1 = arith.constant 0 : index
    %c0_2 = arith.constant 0 : index
    %c0_3 = arith.constant 0 : index
    %1 = vector.load %arg1[%c0_0, %c0_1, %c0_2, %c0_3] : memref<1x4x16x16xf32, #tpu.memory_space<vmem>>, vector<1x1x16x16xf32>
    %2 = vector.shape_cast %1 : vector<1x1x16x16xf32> to vector<16x16xf32>
    %c0_4 = arith.constant 0 : index
    %c0_5 = arith.constant 0 : index
    %c0_6 = arith.constant 0 : index
    %c0_7 = arith.constant 0 : index
    %3 = vector.load %arg2[%c0_4, %c0_5, %c0_6, %c0_7] : memref<4x3x16x7xf32, #tpu.memory_space<vmem>>, vector<1x1x16x7xf32>
    %4 = vector.shape_cast %3 : vector<1x1x16x7xf32> to vector<16x7xf32>
    %cst = arith.constant dense<0.000000e+00> : vector<16x7xf32>
    %5 = tpu.matmul %2, %4, %cst {dimension_numbers = #tpu.dot_dimension_numbers<[1], [0], [0], [1], [0, 0, 1, 1], [], []>} : vector<16x16xf32>, vector<16x7xf32>, vector<16x7xf32> -> vector<16x7xf32>
    %c0_8 = arith.constant 0 : index
    %c1 = arith.constant 1 : index
    %c0_9 = arith.constant 0 : index
    %c0_10 = arith.constant 0 : index
    %6 = vector.load %arg1[%c0_8, %c1, %c0_9, %c0_10] : memref<1x4x16x16xf32, #tpu.memory_space<vmem>>, vector<1x1x16x16xf32>
    %7 = vector.shape_cast %6 : vector<1x1x16x16xf32> to vector<16x16xf32>
    %c1_11 = arith.constant 1 : index
    %c0_12 = arith.constant 0 : index
    %c0_13 = arith.constant 0 : index
    %c0_14 = arith.constant 0 : index
    %8 = vector.load %arg2[%c1_11, %c0_12, %c0_13, %c0_14] : memref<4x3x16x7xf32, #tpu.memory_space<vmem>>, vector<1x1x16x7xf32>
    %9 = vector.shape_cast %8 : vector<1x1x16x7xf32> to vector<16x7xf32>
    %cst_15 = arith.constant dense<0.000000e+00> : vector<16x7xf32>
    %10 = tpu.matmul %7, %9, %cst_15 {dimension_numbers = #tpu.dot_dimension_numbers<[1], [0], [0], [1], [0, 0, 1, 1], [], []>} : vector<16x16xf32>, vector<16x7xf32>, vector<16x7xf32> -> vector<16x7xf32>
    %11 = arith.addf %5, %10 : vector<16x7xf32>
    %c0_16 = arith.constant 0 : index
    %c2 = arith.constant 2 : index
    %c0_17 = arith.constant 0 : index
    %c0_18 = arith.constant 0 : index
    %12 = vector.load %arg1[%c0_16, %c2, %c0_17, %c0_18] : memref<1x4x16x16xf32, #tpu.memory_space<vmem>>, vector<1x1x16x16xf32>
    %13 = vector.shape_cast %12 : vector<1x1x16x16xf32> to vector<16x16xf32>
    %c2_19 = arith.constant 2 : index
    %c0_20 = arith.constant 0 : index
    %c0_21 = arith.constant 0 : index
    %c0_22 = arith.constant 0 : index
    %14 = vector.load %arg2[%c2_19, %c0_20, %c0_21, %c0_22] : memref<4x3x16x7xf32, #tpu.memory_space<vmem>>, vector<1x1x16x7xf32>
    %15 = vector.shape_cast %14 : vector<1x1x16x7xf32> to vector<16x7xf32>
    %cst_23 = arith.constant dense<0.000000e+00> : vector<16x7xf32>
    %16 = tpu.matmul %13, %15, %cst_23 {dimension_numbers = #tpu.dot_dimension_numbers<[1], [0], [0], [1], [0, 0, 1, 1], [], []>} : vector<16x16xf32>, vector<16x7xf32>, vector<16x7xf32> -> vector<16x7xf32>
    %17 = arith.addf %11, %16 : vector<16x7xf32>
    %c0_24 = arith.constant 0 : index
    %c3 = arith.constant 3 : index
    %c0_25 = arith.constant 0 : index
    %c0_26 = arith.constant 0 : index
    %18 = vector.load %arg1[%c0_24, %c3, %c0_25, %c0_26] : memref<1x4x16x16xf32, #tpu.memory_space<vmem>>, vector<1x1x16x16xf32>
    %19 = vector.shape_cast %18 : vector<1x1x16x16xf32> to vector<16x16xf32>
    %c3_27 = arith.constant 3 : index
    %c0_28 = arith.constant 0 : index
    %c0_29 = arith.constant 0 : index
    %c0_30 = arith.constant 0 : index
    %20 = vector.load %arg2[%c3_27, %c0_28, %c0_29, %c0_30] : memref<4x3x16x7xf32, #tpu.memory_space<vmem>>, vector<1x1x16x7xf32>
    %21 = vector.shape_cast %20 : vector<1x1x16x7xf32> to vector<16x7xf32>
    %cst_31 = arith.constant dense<0.000000e+00> : vector<16x7xf32>
    %22 = tpu.matmul %19, %21, %cst_31 {dimension_numbers = #tpu.dot_dimension_numbers<[1], [0], [0], [1], [0, 0, 1, 1], [], []>} : vector<16x16xf32>, vector<16x7xf32>, vector<16x7xf32> -> vector<16x7xf32>
    %23 = arith.addf %17, %22 : vector<16x7xf32>
    %c0_32 = arith.constant 0 : index
    %c0_33 = arith.constant 0 : index
    %c0_34 = arith.constant 0 : index
    %24 = vector.load %arg3[%c0_32, %c0_33, %c0_34] : memref<3x7x16xf32, #tpu.memory_space<vmem>>, vector<1x7x16xf32>
    %25 = vector.shape_cast %24 : vector<1x7x16xf32> to vector<7x16xf32>
    %cst_35 = arith.constant dense<0.000000e+00> : vector<7x7xf32>
    %26 = tpu.matmul %25, %23, %cst_35 {dimension_numbers = #tpu.dot_dimension_numbers<[1], [0], [0], [1], [0, 0, 1, 1], [], []>} : vector<7x16xf32>, vector<16x7xf32>, vector<7x7xf32> -> vector<7x7xf32>
    %c0_36 = arith.constant 0 : index
    %c0_37 = arith.constant 0 : index
    %c0_38 = arith.constant 0 : index
    %c0_39 = arith.constant 0 : index
    %27 = vector.load %arg1[%c0_36, %c0_37, %c0_38, %c0_39] : memref<1x4x16x16xf32, #tpu.memory_space<vmem>>, vector<1x1x16x16xf32>
    %28 = vector.shape_cast %27 : vector<1x1x16x16xf32> to vector<16x16xf32>
    %c0_40 = arith.constant 0 : index
    %c1_41 = arith.constant 1 : index
    %c0_42 = arith.constant 0 : index
    %c0_43 = arith.constant 0 : index
    %29 = vector.load %arg2[%c0_40, %c1_41, %c0_42, %c0_43] : memref<4x3x16x7xf32, #tpu.memory_space<vmem>>, vector<1x1x16x7xf32>
    %30 = vector.shape_cast %29 : vector<1x1x16x7xf32> to vector<16x7xf32>
    %cst_44 = arith.constant dense<0.000000e+00> : vector<16x7xf32>
    %31 = tpu.matmul %28, %30, %cst_44 {dimension_numbers = #tpu.dot_dimension_numbers<[1], [0], [0], [1], [0, 0, 1, 1], [], []>} : vector<16x16xf32>, vector<16x7xf32>, vector<16x7xf32> -> vector<16x7xf32>
    %c0_45 = arith.constant 0 : index
    %c1_46 = arith.constant 1 : index
    %c0_47 = arith.constant 0 : index
    %c0_48 = arith.constant 0 : index
    %32 = vector.load %arg1[%c0_45, %c1_46, %c0_47, %c0_48] : memref<1x4x16x16xf32, #tpu.memory_space<vmem>>, vector<1x1x16x16xf32>
    %33 = vector.shape_cast %32 : vector<1x1x16x16xf32> to vector<16x16xf32>
    %c1_49 = arith.constant 1 : index
    %c1_50 = arith.constant 1 : index
    %c0_51 = arith.constant 0 : index
    %c0_52 = arith.constant 0 : index
    %34 = vector.load %arg2[%c1_49, %c1_50, %c0_51, %c0_52] : memref<4x3x16x7xf32, #tpu.memory_space<vmem>>, vector<1x1x16x7xf32>
    %35 = vector.shape_cast %34 : vector<1x1x16x7xf32> to vector<16x7xf32>
    %cst_53 = arith.constant dense<0.000000e+00> : vector<16x7xf32>
    %36 = tpu.matmul %33, %35, %cst_53 {dimension_numbers = #tpu.dot_dimension_numbers<[1], [0], [0], [1], [0, 0, 1, 1], [], []>} : vector<16x16xf32>, vector<16x7xf32>, vector<16x7xf32> -> vector<16x7xf32>
    %37 = arith.addf %31, %36 : vector<16x7xf32>
    %c0_54 = arith.constant 0 : index
    %c2_55 = arith.constant 2 : index
    %c0_56 = arith.constant 0 : index
    %c0_57 = arith.constant 0 : index
    %38 = vector.load %arg1[%c0_54, %c2_55, %c0_56, %c0_57] : memref<1x4x16x16xf32, #tpu.memory_space<vmem>>, vector<1x1x16x16xf32>
    %39 = vector.shape_cast %38 : vector<1x1x16x16xf32> to vector<16x16xf32>
    %c2_58 = arith.constant 2 : index
    %c1_59 = arith.constant 1 : index
    %c0_60 = arith.constant 0 : index
    %c0_61 = arith.constant 0 : index
    %40 = vector.load %arg2[%c2_58, %c1_59, %c0_60, %c0_61] : memref<4x3x16x7xf32, #tpu.memory_space<vmem>>, vector<1x1x16x7xf32>
    %41 = vector.shape_cast %40 : vector<1x1x16x7xf32> to vector<16x7xf32>
    %cst_62 = arith.constant dense<0.000000e+00> : vector<16x7xf32>
    %42 = tpu.matmul %39, %41, %cst_62 {dimension_numbers = #tpu.dot_dimension_numbers<[1], [0], [0], [1], [0, 0, 1, 1], [], []>} : vector<16x16xf32>, vector<16x7xf32>, vector<16x7xf32> -> vector<16x7xf32>
    %43 = arith.addf %37, %42 : vector<16x7xf32>
    %c0_63 = arith.constant 0 : index
    %c3_64 = arith.constant 3 : index
    %c0_65 = arith.constant 0 : index
    %c0_66 = arith.constant 0 : index
    %44 = vector.load %arg1[%c0_63, %c3_64, %c0_65, %c0_66] : memref<1x4x16x16xf32, #tpu.memory_space<vmem>>, vector<1x1x16x16xf32>
    %45 = vector.shape_cast %44 : vector<1x1x16x16xf32> to vector<16x16xf32>
    %c3_67 = arith.constant 3 : index
    %c1_68 = arith.constant 1 : index
    %c0_69 = arith.constant 0 : index
    %c0_70 = arith.constant 0 : index
    %46 = vector.load %arg2[%c3_67, %c1_68, %c0_69, %c0_70] : memref<4x3x16x7xf32, #tpu.memory_space<vmem>>, vector<1x1x16x7xf32>
    %47 = vector.shape_cast %46 : vector<1x1x16x7xf32> to vector<16x7xf32>
    %cst_71 = arith.constant dense<0.000000e+00> : vector<16x7xf32>
    %48 = tpu.matmul %45, %47, %cst_71 {dimension_numbers = #tpu.dot_dimension_numbers<[1], [0], [0], [1], [0, 0, 1, 1], [], []>} : vector<16x16xf32>, vector<16x7xf32>, vector<16x7xf32> -> vector<16x7xf32>
    %49 = arith.addf %43, %48 : vector<16x7xf32>
    %c1_72 = arith.constant 1 : index
    %c0_73 = arith.constant 0 : index
    %c0_74 = arith.constant 0 : index
    %50 = vector.load %arg3[%c1_72, %c0_73, %c0_74] : memref<3x7x16xf32, #tpu.memory_space<vmem>>, vector<1x7x16xf32>
    %51 = vector.shape_cast %50 : vector<1x7x16xf32> to vector<7x16xf32>
    %cst_75 = arith.constant dense<0.000000e+00> : vector<7x7xf32>
    %52 = tpu.matmul %51, %49, %cst_75 {dimension_numbers = #tpu.dot_dimension_numbers<[1], [0], [0], [1], [0, 0, 1, 1], [], []>} : vector<7x16xf32>, vector<16x7xf32>, vector<7x7xf32> -> vector<7x7xf32>
    %53 = arith.addf %26, %52 : vector<7x7xf32>
    %c0_76 = arith.constant 0 : index
    %c0_77 = arith.constant 0 : index
    %c0_78 = arith.constant 0 : index
    %c0_79 = arith.constant 0 : index
    %54 = vector.load %arg1[%c0_76, %c0_77, %c0_78, %c0_79] : memref<1x4x16x16xf32, #tpu.memory_space<vmem>>, vector<1x1x16x16xf32>
    %55 = vector.shape_cast %54 : vector<1x1x16x16xf32> to vector<16x16xf32>
    %c0_80 = arith.constant 0 : index
    %c2_81 = arith.constant 2 : index
    %c0_82 = arith.constant 0 : index
    %c0_83 = arith.constant 0 : index
    %56 = vector.load %arg2[%c0_80, %c2_81, %c0_82, %c0_83] : memref<4x3x16x7xf32, #tpu.memory_space<vmem>>, vector<1x1x16x7xf32>
    %57 = vector.shape_cast %56 : vector<1x1x16x7xf32> to vector<16x7xf32>
    %cst_84 = arith.constant dense<0.000000e+00> : vector<16x7xf32>
    %58 = tpu.matmul %55, %57, %cst_84 {dimension_numbers = #tpu.dot_dimension_numbers<[1], [0], [0], [1], [0, 0, 1, 1], [], []>} : vector<16x16xf32>, vector<16x7xf32>, vector<16x7xf32> -> vector<16x7xf32>
    %c0_85 = arith.constant 0 : index
    %c1_86 = arith.constant 1 : index
    %c0_87 = arith.constant 0 : index
    %c0_88 = arith.constant 0 : index
    %59 = vector.load %arg1[%c0_85, %c1_86, %c0_87, %c0_88] : memref<1x4x16x16xf32, #tpu.memory_space<vmem>>, vector<1x1x16x16xf32>
    %60 = vector.shape_cast %59 : vector<1x1x16x16xf32> to vector<16x16xf32>
    %c1_89 = arith.constant 1 : index
    %c2_90 = arith.constant 2 : index
    %c0_91 = arith.constant 0 : index
    %c0_92 = arith.constant 0 : index
    %61 = vector.load %arg2[%c1_89, %c2_90, %c0_91, %c0_92] : memref<4x3x16x7xf32, #tpu.memory_space<vmem>>, vector<1x1x16x7xf32>
    %62 = vector.shape_cast %61 : vector<1x1x16x7xf32> to vector<16x7xf32>
    %cst_93 = arith.constant dense<0.000000e+00> : vector<16x7xf32>
    %63 = tpu.matmul %60, %62, %cst_93 {dimension_numbers = #tpu.dot_dimension_numbers<[1], [0], [0], [1], [0, 0, 1, 1], [], []>} : vector<16x16xf32>, vector<16x7xf32>, vector<16x7xf32> -> vector<16x7xf32>
    %64 = arith.addf %58, %63 : vector<16x7xf32>
    %c0_94 = arith.constant 0 : index
    %c2_95 = arith.constant 2 : index
    %c0_96 = arith.constant 0 : index
    %c0_97 = arith.constant 0 : index
    %65 = vector.load %arg1[%c0_94, %c2_95, %c0_96, %c0_97] : memref<1x4x16x16xf32, #tpu.memory_space<vmem>>, vector<1x1x16x16xf32>
    %66 = vector.shape_cast %65 : vector<1x1x16x16xf32> to vector<16x16xf32>
    %c2_98 = arith.constant 2 : index
    %c2_99 = arith.constant 2 : index
    %c0_100 = arith.constant 0 : index
    %c0_101 = arith.constant 0 : index
    %67 = vector.load %arg2[%c2_98, %c2_99, %c0_100, %c0_101] : memref<4x3x16x7xf32, #tpu.memory_space<vmem>>, vector<1x1x16x7xf32>
    %68 = vector.shape_cast %67 : vector<1x1x16x7xf32> to vector<16x7xf32>
    %cst_102 = arith.constant dense<0.000000e+00> : vector<16x7xf32>
    %69 = tpu.matmul %66, %68, %cst_102 {dimension_numbers = #tpu.dot_dimension_numbers<[1], [0], [0], [1], [0, 0, 1, 1], [], []>} : vector<16x16xf32>, vector<16x7xf32>, vector<16x7xf32> -> vector<16x7xf32>
    %70 = arith.addf %64, %69 : vector<16x7xf32>
    %c0_103 = arith.constant 0 : index
    %c3_104 = arith.constant 3 : index
    %c0_105 = arith.constant 0 : index
    %c0_106 = arith.constant 0 : index
    %71 = vector.load %arg1[%c0_103, %c3_104, %c0_105, %c0_106] : memref<1x4x16x16xf32, #tpu.memory_space<vmem>>, vector<1x1x16x16xf32>
    %72 = vector.shape_cast %71 : vector<1x1x16x16xf32> to vector<16x16xf32>
    %c3_107 = arith.constant 3 : index
    %c2_108 = arith.constant 2 : index
    %c0_109 = arith.constant 0 : index
    %c0_110 = arith.constant 0 : index
    %73 = vector.load %arg2[%c3_107, %c2_108, %c0_109, %c0_110] : memref<4x3x16x7xf32, #tpu.memory_space<vmem>>, vector<1x1x16x7xf32>
    %74 = vector.shape_cast %73 : vector<1x1x16x7xf32> to vector<16x7xf32>
    %cst_111 = arith.constant dense<0.000000e+00> : vector<16x7xf32>
    %75 = tpu.matmul %72, %74, %cst_111 {dimension_numbers = #tpu.dot_dimension_numbers<[1], [0], [0], [1], [0, 0, 1, 1], [], []>} : vector<16x16xf32>, vector<16x7xf32>, vector<16x7xf32> -> vector<16x7xf32>
    %76 = arith.addf %70, %75 : vector<16x7xf32>
    %c2_112 = arith.constant 2 : index
    %c0_113 = arith.constant 0 : index
    %c0_114 = arith.constant 0 : index
    %77 = vector.load %arg3[%c2_112, %c0_113, %c0_114] : memref<3x7x16xf32, #tpu.memory_space<vmem>>, vector<1x7x16xf32>
    %78 = vector.shape_cast %77 : vector<1x7x16xf32> to vector<7x16xf32>
    %cst_115 = arith.constant dense<0.000000e+00> : vector<7x7xf32>
    %79 = tpu.matmul %78, %76, %cst_115 {dimension_numbers = #tpu.dot_dimension_numbers<[1], [0], [0], [1], [0, 0, 1, 1], [], []>} : vector<7x16xf32>, vector<16x7xf32>, vector<7x7xf32> -> vector<7x7xf32>
    %80 = arith.addf %53, %79 : vector<7x7xf32>
    %81 = vector.broadcast %0 : f32 to vector<7x7xf32>
    %82 = arith.addf %80, %81 : vector<7x7xf32>
    %cst_116 = arith.constant 0.000000e+00 : f32
    %83 = vector.broadcast %cst_116 : f32 to vector<7x7xf32>
    %84 = arith.cmpf ogt, %82, %83 : vector<7x7xf32>
    %cst_117 = arith.constant -9.200000e-01 : f32
    %85 = vector.broadcast %cst_117 : f32 to vector<7x7xf32>
    %86 = arith.mulf %82, %85 : vector<7x7xf32>
    %87 = arith.select %84, %82, %86 : vector<7x7xi1>, vector<7x7xf32>
    %c0_118 = arith.constant 0 : index
    %c0_119 = arith.constant 0 : index
    %c0_120 = arith.constant 0 : index
    %c0_121 = arith.constant 0 : index
    %88 = vector.load %arg5[%c0_118, %c0_119, %c0_120, %c0_121] : memref<1x1x7x7xf32, #tpu.memory_space<vmem>>, vector<1x1x7x7xf32>
    %89 = vector.shape_cast %88 : vector<1x1x7x7xf32> to vector<7x7xf32>
    %90 = vector.shape_cast %87 : vector<7x7xf32> to vector<1x1x7x7xf32>
    tpu.vector_store %arg5[%c0_118, %c0_119, %c0_120, %c0_121], %90 {strides = array<i32>} : memref<1x1x7x7xf32, #tpu.memory_space<vmem>>, vector<1x1x7x7xf32>,
    return
  }
  func.func @transform_0(%arg0: i32) -> (i32, i32, i32, i32) {
    %c0_i32 = arith.constant 0 : i32
    %c0_i32_0 = arith.constant 0 : i32
    %c0_i32_1 = arith.constant 0 : i32
    %c0_i32_2 = arith.constant 0 : i32
    return %arg0, %c0_i32, %c0_i32_0, %c0_i32_1 : i32, i32, i32, i32
  }
  func.func @transform_1(%arg0: i32) -> (i32, i32, i32, i32) {
    %c0_i32 = arith.constant 0 : i32
    %c0_i32_0 = arith.constant 0 : i32
    %c0_i32_1 = arith.constant 0 : i32
    %c0_i32_2 = arith.constant 0 : i32
    %c0_i32_3 = arith.constant 0 : i32
    return %c0_i32, %c0_i32_0, %c0_i32_1, %c0_i32_2 : i32, i32, i32, i32
  }
  func.func @transform_2(%arg0: i32) -> (i32, i32, i32) {
    %c0_i32 = arith.constant 0 : i32
    %c0_i32_0 = arith.constant 0 : i32
    %c0_i32_1 = arith.constant 0 : i32
    %c0_i32_2 = arith.constant 0 : i32
    return %c0_i32, %c0_i32_0, %c0_i32_1 : i32, i32, i32
  }
  func.func @transform_3(%arg0: i32) -> i32 {
    %c0_i32 = arith.constant 0 : i32
    %c0_i32_0 = arith.constant 0 : i32
    return %c0_i32 : i32
  }
  func.func @transform_4(%arg0: i32) -> (i32, i32, i32, i32) {
    %c0_i32 = arith.constant 0 : i32
    %c0_i32_0 = arith.constant 0 : i32
    %c0_i32_1 = arith.constant 0 : i32
    %c0_i32_2 = arith.constant 0 : i32
    return %arg0, %c0_i32, %c0_i32_0, %c0_i32_1 : i32, i32, i32, i32
  }
}

</mosaic_0001>

<bundles_post_ra>
// kernel: model_forward.1
= control target key start
LH: loop header
LB: loop body
LE: loop exit
PB: predicated region body
PF: predicated region fallthrough
CT: control target
= control target key end

     0   :  { %s1821_s17 = smov 0   ;;  %s1998_s0 = inlined_call_operand.vmem [shape: f32[2,4,16,16], index: 0, kind: input, shape index: {}]   ;;  %s1999_s1 = inlined_call_operand.vmem [shape: f32[4,3,16,7], index: 1, kind: input, shape index: {}]   ;;  %s2000_s2 = inlined_call_operand.vmem [shape: f32[3,7,16], index: 2, kind: input, shape index: {}]   ;;  %s2001_s3 = inlined_call_operand.<no memory space> [shape: f32[1], index: 3, kind: input, shape index: {}]   ;;  %s2002_s4 = inlined_call_operand.vmem [shape: f32[2,1,7,7], index: 4, kind: output, shape index: {}]  }
   0x1   :  { %9 = sst [smem:[#allocation2]] %s2001_s3 }
   0x2 LB: > { %s1466_s18 = sadd.s32 4294967295, %s1788_s17   ;;  %p1470_p0 = scmp.ge.s32.totalorder %s1788_s17, 1  ;;  %s1788_s17 = sphi %s1821_s17, %s15_s17  }
   0x3   : > { %p163_p1 = scmp.lt.s32.totalorder %s1788_s17, 3 }
   0x5   : > { %p164_p2 = pnand %p1470_p0, %p163_p1 }
   0x6   : > { %v1476_v0 = vld [vmem:[%s1999_s1 + $0x30] sm:$0xff] (!%p164_p2)  ;;  %v1477_v1 = vld [vmem:[%s1999_s1 + $0x38] sm:$0xff] (!%p164_p2)  ;;  %v200_v2 = vld [vmem:[%s1999_s1] sm:$0xff] (!%p164_p2)  ;;  %p188_p3 = scmp.lt.s32.totalorder (!%p164_p2), %s1466_s18, 1  ;;  %vm208_vm0 = vcmask (!%p164_p2), 130048   ;;  %v1790_v32 = vmov (!%p164_p2), 0.0|0.0  }
   0x7   : > { %167 = sbr.rel (%p164_p2) target bundleno = 731 (0x2db), region = 36  ;;  %v1696_v3 = vpack.c.bf16 (!%p164_p2), %v1477_v1, %v1476_v0  ;;  %v201_v4 = vld [vmem:[%s1999_s1 + $0x8] sm:$0xff] (!%p164_p2)  ;;  %v1496_v5 = vld [vmem:[%s1999_s1 + $0x40] sm:$0xff] (!%p164_p2)  ;;  %v1494_v12 = vld [vmem:[%s1999_s1 + $0x10] sm:$0xff] (!%p164_p2)  ;;  %vm1791_vm1 = vmmov (!%p164_p2), 0   ;;  %v1792_v33 = vmov (!%p164_p2), 0.0  }
   0x8   : > { %v1497_v6 = vld [vmem:[%s1999_s1 + $0x48] sm:$0xff] (!%p164_p2)  ;;  %v1700_v7 = vpack.c.bf16 (!%p164_p2), %v201_v4, %v200_v2  ;;  %v1484_v9 = vld [vmem:[%s1999_s1 + $0x60] sm:$0xff] (!%p164_p2)  ;;  %v1495_v13 = vld [vmem:[%s1999_s1 + $0x18] sm:$0xff] (!%p164_p2)  ;;  %s197_s26 = sld [smem:[#allocation2]] (!%p164_p2)  ;;  %vm1411_vm3 = vcmask (!%p164_p2), 55296  }
   0x9   : > { %v1712_v8 = vpack.c.bf16 (!%p164_p2), %v1497_v6, %v1496_v5  ;;  %v1485_v10 = vld [vmem:[%s1999_s1 + $0x68] sm:$0xff] (!%p164_p2)  ;;  %1697 = vmatprep.subr.bf16.mxu1 (!%p164_p2), %v1696_v3  ;;  %v1490_v14 = vld [vmem:[%s1999_s1 + $0x90] sm:$0xff] (!%p164_p2)  ;;  %v1491_v15 = vld [vmem:[%s1999_s1 + $0x98] sm:$0xff] (!%p164_p2)  ;;  %v1716_v19 = vpack.c.bf16 (!%p164_p2), %v1495_v13, %v1494_v12 }
   0xa   : > { %v1704_v11 = vpack.c.bf16 (!%p164_p2), %v1485_v10, %v1484_v9  ;;  %1701 = vmatprep.subr.bf16.mxu0 (!%p164_p2), %v1700_v7  ;;  %1699 = vmatpush3.bf16.msra.mxu1 (!%p164_p2), %v1696_v3  ;;  %v1708_v21 = vpack.c.bf16 (!%p164_p2), %v1491_v15, %v1490_v14  ;;  %v1502_v22 = vld [vmem:[%s1999_s1 + $0x70] sm:$0xff] (!%p164_p2)  ;;  %v1503_v23 = vld [vmem:[%s1999_s1 + $0x78] sm:$0xff] (!%p164_p2)  ;;  %v1506_v28 = vld [vmem:[%s1999_s1 + $0xa0] sm:$0xff] (!%p164_p2) }
   0xb   : > { %1703 = vmatpush3.bf16.msra.mxu0 (!%p164_p2), %v1700_v7  ;;  %1713 = vmatprep.subr.bf16.mxu1 (!%p164_p2), %v1712_v8  ;;  %v1720_v25 = vpack.c.bf16 (!%p164_p2), %v1503_v23, %v1502_v22  ;;  %v1507_v29 = vld [vmem:[%s1999_s1 + $0xa8] sm:$0xff] (!%p164_p2)  ;;  %v549_v41 = vld [vmem:[%s2000_s2] sm:$0x7f] (!%p164_p2)  ;;  %v1515_v42 = vld [vmem:[%s1999_s1 + $0x50] sm:$0xff] (!%p164_p2) }
   0xc   : > { %1705 = vmatprep.subr.bf16.mxu0 (!%p164_p2), %v1704_v11  ;;  %v1724_v30 = vpack.c.bf16 (!%p164_p2), %v1507_v29, %v1506_v28  ;;  %v1516_v43 = vld [vmem:[%s1999_s1 + $0x58] sm:$0xff] (!%p164_p2)  ;;  %v1513_v48 = vld [vmem:[%s1999_s1 + $0x20] sm:$0xff] (!%p164_p2)  ;;  %v1514_v49 = vld [vmem:[%s1999_s1 + $0x28] sm:$0xff] (!%p164_p2) }
   0xd   : > { %v1734_v46 = vpack.c.bf16 (!%p164_p2), %v1516_v43, %v1515_v42  ;;  %v1510_v50 = vld [vmem:[%s2000_s2 + $0x8] sm:$0x7f] (!%p164_p2)  ;;  %v1738_v51 = vpack.c.bf16 (!%p164_p2), %v1514_v49, %v1513_v48  ;;  %v1521_v52 = vld [vmem:[%s1999_s1 + $0x80] sm:$0xff] (!%p164_p2)  ;;  %v1525_v55 = vld [vmem:[%s1999_s1 + $0xb0] sm:$0xff] (!%p164_p2) }
   0xe   : > { %s2004_s18 = smov (!%p188_p3, %s1466_s18), 1  ;;  %v1522_v53 = vld [vmem:[%s1999_s1 + $0x88] sm:$0xff]  ;;  %v1526_v56 = vld [vmem:[%s1999_s1 + $0xb8] sm:$0xff]  ;;  %v1529_v2 = vld [vmem:[%s2000_s2 + $0x10] sm:$0x7f]  ;;  %v1406_v4 = vstv %s197_s26 }
   0xf   : > { %s1533_s12 = sshll.u32 %s2004_s18, 6  ;;  %v1742_v54 = vpack.c.bf16 %v1522_v53, %v1521_v52  ;;  %v1746_v57 = vpack.c.bf16 %v1526_v56, %v1525_v55  ;;  %s1473_s27 = sshll.u32 %s2004_s18, 3 }
  0x10   : > { %s1871_s3 = scalar_lea.vmem %s1998_s0, %s1533_s12  ;;  %s196_s30 = scalar_lea.vmem %s2002_s4, %s1473_s27 }
  0x11   : > { %v1874_v16 = vld [vmem:[%s1871_s3 + $0x10] sm:$0xff]  ;;  %v1877_v17 = vld [vmem:[%s1871_s3] sm:$0xff]  ;;  %v1880_v18 = vld [vmem:[%s1871_s3 + $0x18] sm:$0xff] }
  0x12   : > { %1595 = vmatprep.mubr.msk.f32.mxu1 %vm208_vm0, %v1874_v16  ;;  %1602 = vmatprep.mubr.msk.f32.mxu0 %vm208_vm0, %v1877_v17  ;;  %v1887_v20 = vld [vmem:[%s1871_s3 + $0x8] sm:$0xff]  ;;  %v1900_v24 = vld [vmem:[%s1871_s3 + $0x20] sm:$0xff]  ;;  %v1914_v27 = vld [vmem:[%s1871_s3 + $0x30] sm:$0xff] }
  0x13   : > { %1596 = vmatmul.mubr.msk.f32.vlgmr.msra.gmra.mrb[0].mxu1 %vm208_vm0, %v1880_v18  ;;  %1603 = vmatmul.mubr.msk.f32.vlgmr.msra.gmra.mrb[0].mxu0 %vm208_vm0, %v1887_v20  ;;  %v1909_v26 = vld [vmem:[%s1871_s3 + $0x28] sm:$0xff]  ;;  %v1489_v31 = vld [vmem:[%s1871_s3 + $0x38] sm:$0xff] }
  0x14   : > { %1715 = vmatpush3.bf16.msra.mxu1 %v1712_v8  ;;  %1623 = vmatprep.mubr.msk.f32.mxu1 %vm208_vm0, %v1874_v16 }
  0x15   : > { %1717 = vmatprep.subr.bf16.mxu1 %v1716_v19  ;;  %1707 = vmatpush3.bf16.msra.mxu0 %v1704_v11 }
  0x16   : > { %1609 = vmatprep.mubr.msk.f32.mxu0 %vm208_vm0, %v1900_v24  ;;  %1709 = vmatprep.subr.bf16.mxu0 %v1708_v21 }
  0x17   : > { %1624 = vmatmul.mubr.msk.f32.vlgmr.msra.gmra.mrb[2].mxu1 %vm208_vm0, %v1880_v18 }
  0x18   : > { %1719 = vmatpush3.bf16.msra.mxu1 %v1716_v19  ;;  %1630 = vmatprep.mubr.msk.f32.mxu1 %vm208_vm0, %v1877_v17 }
  0x19   : > { %1721 = vmatprep.subr.bf16.mxu1 %v1720_v25 }
  0x1b   : > { %1610 = vmatmul.mubr.msk.f32.vlgmr.msra.gmra.mrb[0].mxu0 %vm208_vm0, %v1909_v26 }
  0x1c   : > { %1711 = vmatpush3.bf16.msra.mxu0 %v1708_v21  ;;  %1616 = vmatprep.mubr.msk.f32.mxu0 %vm208_vm0, %v1914_v27 }
  0x1d   : > { %1728 = vmatprep.subr.bf16.mxu0 %v1790_v32 }
  0x1f   : > { %1631 = vmatmul.mubr.msk.f32.vlgmr.msra.gmra.mrb[2].mxu1 %vm208_vm0, %v1887_v20 }
  0x20   : > { %1723 = vmatpush3.bf16.msra.mxu1 %v1720_v25  ;;  %1637 = vmatprep.mubr.msk.f32.mxu1 %vm208_vm0, %v1900_v24 }
  0x21   : > { %1725 = vmatprep.subr.bf16.mxu1 %v1724_v30 }
  0x23   : > { %1617 = vmatmul.mubr.msk.f32.vlgmr.msra.gmra.mrb[0].mxu0 %vm208_vm0, %v1489_v31 }
  0x24   : > { %1651 = vmatprep.mubr.msk.f32.mxu0 %vm1791_vm1, %v1792_v33 }
  0x27   : > { %1638 = vmatmul.mubr.msk.f32.vlgmr.msra.gmra.mrb[2].mxu1 %vm208_vm0, %v1909_v26 }
  0x28   : > { %1727 = vmatpush3.bf16.msra.mxu1 %v1724_v30  ;;  %1644 = vmatprep.mubr.msk.f32.mxu1 %vm208_vm0, %v1914_v27 }
  0x29   : > { %1731 = vmatprep.subr.bf16.mxu1 %v1790_v32 }
  0x2f   : > { %1645 = vmatmul.mubr.msk.f32.vlgmr.msra.gmra.mrb[2].mxu1 %vm208_vm0, %v1489_v31 }
  0x30   : > { %1658 = vmatprep.mubr.msk.f32.mxu1 %vm1791_vm1, %v1792_v33 }
  0xe6   : > { %v1597_v34 = vpop.f32.mrb[0].mxu1 }
  0xe7   : > { %v281_v35 = vpop.f32.mrb[1].mxu1 }
  0xf6   : > { %v1618_v36 = vpop.f32.mrb[0].mxu0 }
  0xf7   : > { %v1753_v37 = vadd.f32 %v1618_v36, %v1597_v34  ;;  %v538_v38 = vpop.f32.mrb[1].mxu0 }
  0xf8   : > { %v1754_v39 = vadd.f32 %v538_v38, %v281_v35 }
  0xfa   : > { %v1732_v40 = vpack.c.bf16 %v1753_v37, %v1754_v39 }
  0xfc   : > { %1733 = vmatpush3.bf16.msra.mxu1 %v1732_v40 }
  0xfd   : > { %1750 = vmatprep.subr.bf16.mxu1 %v1790_v32 }
  0xff   : > { %1659 = vmatmul.mubr.msk.f32.vlgmr.msra.gmra.mrb[4].mxu1 %vm208_vm0, %v549_v41 }
 0x100   : > { %1693 = vmatprep.mubr.msk.f32.mxu1 %vm1791_vm1, %v1792_v33 }
 0x102   : > { %v1646_v44 = vpop.f32.mrb[2].mxu1 }
 0x103   : > { %v855_v45 = vpop.f32.mrb[3].mxu1 }
 0x104   : > { %v1729_v47 = vpack.c.bf16 %v1646_v44, %v855_v45 }
 0x106   : > { %1730 = vmatpush3.bf16.msra.mxu0 %v1729_v47 }
 0x107   : > { %1735 = vmatprep.subr.bf16.mxu0 %v1734_v46 }
 0x109   : > { %1652 = vmatmul.mubr.msk.f32.vlgmr.msra.gmra.mrb[2].mxu0 %vm208_vm0, %v1510_v50 }
 0x10a   : > { %1737 = vmatpush3.bf16.msra.mxu0 %v1734_v46  ;;  %1665 = vmatprep.mubr.msk.f32.mxu0 %vm208_vm0, %v1874_v16 }
 0x10b   : > { %1739 = vmatprep.subr.bf16.mxu0 %v1738_v51 }
 0x10d   : > { %1666 = vmatmul.mubr.msk.f32.vlgmr.msra.gmra.mrb[4].mxu0 %vm208_vm0, %v1880_v18 }
 0x10e   : > { %1741 = vmatpush3.bf16.msra.mxu0 %v1738_v51  ;;  %1672 = vmatprep.mubr.msk.f32.mxu0 %vm208_vm0, %v1877_v17 }
 0x10f   : > { %1743 = vmatprep.subr.bf16.mxu0 %v1742_v54 }
 0x115   : > { %1673 = vmatmul.mubr.msk.f32.vlgmr.msra.gmra.mrb[4].mxu0 %vm208_vm0, %v1887_v20 }
 0x116   : > { %1745 = vmatpush3.bf16.msra.mxu0 %v1742_v54  ;;  %1679 = vmatprep.mubr.msk.f32.mxu0 %vm208_vm0, %v1900_v24 }
 0x117   : > { %1747 = vmatprep.subr.bf16.mxu0 %v1746_v57 }
 0x11d   : > { %1680 = vmatmul.mubr.msk.f32.vlgmr.msra.gmra.mrb[4].mxu0 %vm208_vm0, %v1909_v26 }
 0x11e   : > { %1749 = vmatpush3.bf16.msra.mxu0 %v1746_v57  ;;  %1686 = vmatprep.mubr.msk.f32.mxu0 %vm208_vm0, %v1914_v27 }
 0x125   : > { %1687 = vmatmul.mubr.msk.f32.vlgmr.msra.gmra.mrb[4].mxu0 %vm208_vm0, %v1489_v31 }
 0x1d2   : > { %v1010_v58 = vpop.f32.mrb[4].mxu1 }
 0x1d3   : > { %v1660_v59 = vpop.f32.mrb[5].mxu1 }
 0x1dc   : > { %v937_v60 = vpop.f32.mrb[2].mxu0 }
 0x1dd   : > { %v1011_v61 = vadd.f32 %v1010_v58, %v937_v60  ;;  %v1653_v62 = vpop.f32.mrb[3].mxu0 }
 0x1f8   : > { %v1688_v63 = vpop.f32.mrb[4].mxu0 }
 0x1f9   : > { %v1319_v0 = vpop.f32.mrb[5].mxu0 }
 0x1fa   : > { %v1751_v1 = vpack.c.bf16 %v1688_v63, %v1319_v0 }
 0x1fc   : > { %1752 = vmatpush3.bf16.msra.mxu1 %v1751_v1 }
 0x1ff   : > { %1694 = vmatmul.mubr.msk.f32.vlgmr.msra.gmra.mrb[6].mxu1 %vm208_vm0, %v1529_v2 }
 0x2d2   : > { %v1401_v3 = vpop.f32.mrb[6].mxu1 }
 0x2d3   : > { %v1405_v5 = vadd.f32 %v1401_v3, %v1011_v61  ;;  %v1695_v6 = vpop.f32.mrb[7].mxu1 }
 0x2d5   : > { %v1407_v7 = vadd.f32 %v1406_v4, %v1405_v5 }
 0x2d7   : > { %vm1408_vm2 = vcmp.gt.f32.partialorder %v1407_v7, 0.0  ;;  %v1409_v8 = vmul.f32 -0.92, %v1407_v7 }
 0x2d9   : > { %v1410_v9 = vsel %vm1408_vm2, %v1407_v7, %v1409_v8 }
 0x2da   : > { %1412 = vst.msk [vmem:[%s196_s30] sm:$0x7f] %vm1411_vm3, %v1410_v9 }
 0x2db PF: > { %s15_s17 = sadd.s32 1, %s1788_s17  }
 0x2dc   : > { %p12_p4 = scmp.ge.s32.totalorder %s15_s17, 4  }
 0x2de   :  { %14 = sbr.rel (!%p12_p4) target bundleno = 2 (0x2), region = 82 }

</bundles_post_ra>
